<compile_context>
chip_gen: v7x
topology: tpu7x:2x2x1
jax: 0.10.0
libtpu: 0.0.40
codegen_flags: <defaults>
</compile_context>

<pallas_src>
import functools

import jax
import jax.numpy as jnp
from jax.experimental import pallas as pl
from jax.experimental.pallas import tpu as pltpu


PACK = 8             # original rows packed per lane-dense super-row
DEFAULT_TILE = 4096  # packed rows per grid step (=> 32768 original rows)


def _round_up(a, b):
    return ((a + b - 1) // b) * b


def _batch_transform_kernel(x_ref, w1_ref, b1_ref, w2_ref, b2_ref, o_ref):
    # Fused: linear -> relu -> linear -> (Identity norm) -> relu, all in VMEM.
    x = x_ref[...]                                    # bf16, lane-dense [tn, 256]
    # bf16 x bf16 -> f32 accumulate on the MXU (single-pass issue).
    h = jnp.dot(x, w1_ref[...], preferred_element_type=jnp.float32)
    h = jnp.maximum(h + b1_ref[...], 0.0)             # f32 bias-add + ReLU (VPU)
    y = jnp.dot(h.astype(jnp.bfloat16), w2_ref[...],
                preferred_element_type=jnp.float32)
    # NodeTransform.norm is Identity ('no norm'), then ReLU activation.
    o_ref[...] = jnp.maximum(y + b2_ref[...], 0.0).astype(o_ref.dtype)


def _pack_params(w1, b1, w2, b2, pack=PACK):
    """Block-diagonalize weights so `pack` rows are processed per lane-dense row."""
    eye = jnp.eye(pack, dtype=w1.dtype)
    w1_bd = jnp.kron(eye, w1).astype(jnp.bfloat16)            # [pack*D_in, pack*H]
    w2_bd = jnp.kron(eye, w2).astype(jnp.bfloat16)            # [pack*H,  pack*D_out]
    b1_t = jnp.tile(b1.reshape(1, -1), (1, pack)).astype(jnp.float32)  # [1, pack*H]
    b2_t = jnp.tile(b2.reshape(1, -1), (1, pack)).astype(jnp.float32)  # [1, pack*D_out]
    return w1_bd, b1_t, w2_bd, b2_t


@functools.partial(jax.jit, static_argnames=("tile_rows",))
def batch_transform(x, w1, b1, w2, b2, tile_rows=DEFAULT_TILE):
    """x: [N, D_in], w1: [D_in, H], b1: [1, H], w2: [H, D_out], b2: [1, D_out].

    Weights are stored pre-transposed to [in, out] so the kernel does plain x @ W.
    """
    n, d_in = x.shape
    h_dim = w1.shape[1]
    d_out = w2.shape[1]

    w1_bd, b1_t, w2_bd, b2_t = _pack_params(w1, b1, w2, b2)

    # Pad only to the 64-row (= 8 packed sublanes) granularity; aligned N is
    # zero-copy. Padded rows compute garbage and are sliced off at the end.
    n_pad = _round_up(n, PACK * 8)
    if n_pad != n:
        x = jnp.pad(x, ((0, n_pad - n), (0, 0)))
    r = n_pad // PACK                                  # packed rows (multiple of 8)
    # Row-major reshape is a free metadata op; bf16 cast halves the per-step DMA
    # (and is a no-op if the caller already passes bf16 activations).
    x_packed = x.reshape(r, PACK * d_in).astype(jnp.bfloat16)

    # Tile: multiple of 8 sublanes, N-aware so the grid has >=4 steps when
    # possible (keeps the double-buffer pipeline busy / both v7x TCs fed).
    tile_rows = _round_up(max(int(tile_rows), 8), 8)
    tn = min(tile_rows, _round_up(pl.cdiv(r, 4), 8))
    grid = (pl.cdiv(r, tn),)                           # ragged last block is masked

    flops = 2 * r * (PACK * d_in * PACK * h_dim + PACK * h_dim * PACK * d_out)
    bytes_accessed = (
        r * PACK * d_in * 2                            # x (bf16 in)
        + r * PACK * d_out * 4                         # y (f32 out)
        + (PACK * d_in) * (PACK * h_dim) * 2           # packed W1 (bf16)
        + (PACK * h_dim) * (PACK * d_out) * 2          # packed W2 (bf16)
        + PACK * (h_dim + d_out) * 4                   # tiled biases (f32)
    )

    out_packed = pl.pallas_call(
        _batch_transform_kernel,
        out_shape=jax.ShapeDtypeStruct((r, PACK * d_out), jnp.float32),
        grid_spec=pltpu.PrefetchScalarGridSpec(
            num_scalar_prefetch=0,
            grid=grid,
            in_specs=[
                # Row-tiled, double-buffered activations (bf16 -> half the bytes).
                pl.BlockSpec((tn, PACK * d_in), lambda i: (i, 0)),
                # Small packed weights/biases: constant index_map -> VMEM-resident.
                pl.BlockSpec(w1_bd.shape, lambda i: (0, 0)),
                pl.BlockSpec(b1_t.shape, lambda i: (0, 0)),
                pl.BlockSpec(w2_bd.shape, lambda i: (0, 0)),
                pl.BlockSpec(b2_t.shape, lambda i: (0, 0)),
            ],
            out_specs=pl.BlockSpec((tn, PACK * d_out), lambda i: (i, 0)),
        ),
        compiler_params=pltpu.CompilerParams(
            # Independent row tiles: shard across both TensorCores on v7x.
            dimension_semantics=("parallel",),
            # Headroom for the 4096-row bf16 default tile on every generation
            # (v5e scoped default is only 16 MiB; physical VMEM >= 64 MiB).
            vmem_limit_bytes=48 * 1024 * 1024,
        ),
        cost_estimate=pl.CostEstimate(
            flops=flops, transcendentals=0, bytes_accessed=bytes_accessed),
    )(x_packed, w1_bd, b1_t, w2_bd, b2_t)

    return out_packed.reshape(n_pad, d_out)[:n]


def batch_transform_ref(x, w1, b1, w2, b2):
    h = jnp.maximum(x @ w1 + b1, 0.0)
    return jnp.maximum(h @ w2 + b2, 0.0)


if __name__ == "__main__":
    # Small shapes consistent with the module: layer_dim = [32, 64, 16], batch = 8.
    N, D_IN, H, D_OUT = 8, 32, 64, 16

    key = jax.random.PRNGKey(0)
    kx, kw1, kb1, kw2, kb2 = jax.random.split(key, 5)

    x = jax.random.normal(kx, (N, D_IN), dtype=jnp.float32)

    # Deterministic parameter init (PyTorch-Linear-style uniform bounds),
    # stored already transposed to [in, out] for the kernel.
    bound1 = 1.0 / (D_IN ** 0.5)
    w1 = jax.random.uniform(kw1, (D_IN, H), minval=-bound1, maxval=bound1, dtype=jnp.float32)
    b1 = jax.random.uniform(kb1, (1, H), minval=-bound1, maxval=bound1, dtype=jnp.float32)
    bound2 = 1.0 / (H ** 0.5)
    w2 = jax.random.uniform(kw2, (H, D_OUT), minval=-bound2, maxval=bound2, dtype=jnp.float32)
    b2 = jax.random.uniform(kb2, (1, D_OUT), minval=-bound2, maxval=bound2, dtype=jnp.float32)

    out = jax.block_until_ready(batch_transform(x, w1, b1, w2, b2))
    ref = batch_transform_ref(x, w1, b1, w2, b2)
    assert out.shape == (N, D_OUT)
    # bf16 MXU operands -> relaxed tolerance vs the f32 reference.
    assert jnp.allclose(out, ref, atol=3e-2, rtol=3e-2), float(jnp.max(jnp.abs(out - ref)))

    # Second check: uneven N with a small tile to exercise the multi-step grid,
    # 64-row minimal padding, and the ragged (masked) last block.
    N2 = 2050
    x2 = jax.random.normal(jax.random.PRNGKey(1), (N2, D_IN), dtype=jnp.float32)
    out2 = jax.block_until_ready(batch_transform(x2, w1, b1, w2, b2, tile_rows=128))
    ref2 = batch_transform_ref(x2, w1, b1, w2, b2)
    assert out2.shape == (N2, D_OUT)
    assert jnp.allclose(out2, ref2, atol=3e-2, rtol=3e-2), float(jnp.max(jnp.abs(out2 - ref2)))

    print("KERNEL_OK")
</pallas_src>

<mosaic_0001>
module attributes {stable_mosaic.version = 11 : i64} {
  func.func @_batch_transform_kernel(%arg0: i32, %arg1: memref<8x256xbf16, #tpu.memory_space<vmem>>, %arg2: memref<256x512xbf16, #tpu.memory_space<vmem>>, %arg3: memref<1x512xf32, #tpu.memory_space<vmem>>, %arg4: memref<512x128xbf16, #tpu.memory_space<vmem>>, %arg5: memref<1x128xf32, #tpu.memory_space<vmem>>, %arg6: memref<8x128xf32, #tpu.memory_space<vmem>>) attributes {dimension_semantics = [#tpu.dimension_semantics<parallel>], iteration_bounds = array<i64: 1>, scalar_prefetch = 0 : i64, scratch_operands = 0 : i64, tpu.core_type = #tpu.core_type<tc>, window_params = [{transform_indices = @transform_0, window_bounds = array<i64: 8, 256>}, {pipeline_mode = #tpu.pipeline_mode<synchronous>, transform_indices = @transform_1, window_bounds = array<i64: 256, 512>}, {pipeline_mode = #tpu.pipeline_mode<synchronous>, transform_indices = @transform_2, window_bounds = array<i64: 1, 512>}, {pipeline_mode = #tpu.pipeline_mode<synchronous>, transform_indices = @transform_3, window_bounds = array<i64: 512, 128>}, {pipeline_mode = #tpu.pipeline_mode<synchronous>, transform_indices = @transform_4, window_bounds = array<i64: 1, 128>}, {transform_indices = @transform_5, window_bounds = array<i64: 8, 128>}]} {
    %c0 = arith.constant 0 : index
    %c0_0 = arith.constant 0 : index
    %0 = vector.load %arg1[%c0, %c0_0] : memref<8x256xbf16, #tpu.memory_space<vmem>>, vector<8x256xbf16>
    %c0_1 = arith.constant 0 : index
    %c0_2 = arith.constant 0 : index
    %1 = vector.load %arg2[%c0_1, %c0_2] : memref<256x512xbf16, #tpu.memory_space<vmem>>, vector<256x512xbf16>
    %cst = arith.constant dense<0.000000e+00> : vector<8x512xf32>
    %2 = tpu.matmul %0, %1, %cst {dimension_numbers = #tpu.dot_dimension_numbers<[1], [0], [0], [1], [0, 0, 1, 1], [], []>} : vector<8x256xbf16>, vector<256x512xbf16>, vector<8x512xf32> -> vector<8x512xf32>
    %c0_3 = arith.constant 0 : index
    %c0_4 = arith.constant 0 : index
    %3 = vector.load %arg3[%c0_3, %c0_4] : memref<1x512xf32, #tpu.memory_space<vmem>>, vector<1x512xf32>
    %4 = vector.broadcast %3 : vector<1x512xf32> to vector<8x512xf32>
    %5 = arith.addf %2, %4 : vector<8x512xf32>
    %cst_5 = arith.constant 0.000000e+00 : f32
    %6 = vector.broadcast %cst_5 : f32 to vector<8x512xf32>
    %7 = arith.maximumf %5, %6 : vector<8x512xf32>
    %8 = arith.truncf %7 : vector<8x512xf32> to vector<8x512xbf16>
    %c0_6 = arith.constant 0 : index
    %c0_7 = arith.constant 0 : index
    %9 = vector.load %arg4[%c0_6, %c0_7] : memref<512x128xbf16, #tpu.memory_space<vmem>>, vector<512x128xbf16>
    %cst_8 = arith.constant dense<0.000000e+00> : vector<8x128xf32>
    %10 = tpu.matmul %8, %9, %cst_8 {dimension_numbers = #tpu.dot_dimension_numbers<[1], [0], [0], [1], [0, 0, 1, 1], [], []>} : vector<8x512xbf16>, vector<512x128xbf16>, vector<8x128xf32> -> vector<8x128xf32>
    %c0_9 = arith.constant 0 : index
    %c0_10 = arith.constant 0 : index
    %11 = vector.load %arg5[%c0_9, %c0_10] : memref<1x128xf32, #tpu.memory_space<vmem>>, vector<1x128xf32>
    %12 = vector.broadcast %11 : vector<1x128xf32> to vector<8x128xf32>
    %13 = arith.addf %10, %12 : vector<8x128xf32>
    %cst_11 = arith.constant 0.000000e+00 : f32
    %14 = vector.broadcast %cst_11 : f32 to vector<8x128xf32>
    %15 = arith.maximumf %13, %14 : vector<8x128xf32>
    %c0_12 = arith.constant 0 : index
    %c0_13 = arith.constant 0 : index
    %16 = vector.load %arg6[%c0_12, %c0_13] : memref<8x128xf32, #tpu.memory_space<vmem>>, vector<8x128xf32>
    tpu.vector_store %arg6[%c0_12, %c0_13], %15 {strides = array<i32>} : memref<8x128xf32, #tpu.memory_space<vmem>>, vector<8x128xf32>,
    return
  }
  func.func @transform_0(%arg0: i32) -> (i32, i32) {
    %c0_i32 = arith.constant 0 : i32
    %c0_i32_0 = arith.constant 0 : i32
    return %arg0, %c0_i32 : i32, i32
  }
  func.func @transform_1(%arg0: i32) -> (i32, i32) {
    %c0_i32 = arith.constant 0 : i32
    %c0_i32_0 = arith.constant 0 : i32
    %c0_i32_1 = arith.constant 0 : i32
    return %c0_i32, %c0_i32_0 : i32, i32
  }
  func.func @transform_2(%arg0: i32) -> (i32, i32) {
    %c0_i32 = arith.constant 0 : i32
    %c0_i32_0 = arith.constant 0 : i32
    %c0_i32_1 = arith.constant 0 : i32
    return %c0_i32, %c0_i32_0 : i32, i32
  }
  func.func @transform_3(%arg0: i32) -> (i32, i32) {
    %c0_i32 = arith.constant 0 : i32
    %c0_i32_0 = arith.constant 0 : i32
    %c0_i32_1 = arith.constant 0 : i32
    return %c0_i32, %c0_i32_0 : i32, i32
  }
  func.func @transform_4(%arg0: i32) -> (i32, i32) {
    %c0_i32 = arith.constant 0 : i32
    %c0_i32_0 = arith.constant 0 : i32
    %c0_i32_1 = arith.constant 0 : i32
    return %c0_i32, %c0_i32_0 : i32, i32
  }
  func.func @transform_5(%arg0: i32) -> (i32, i32) {
    %c0_i32 = arith.constant 0 : i32
    %c0_i32_0 = arith.constant 0 : i32
    return %arg0, %c0_i32 : i32, i32
  }
}

</mosaic_0001>

<bundles_post_ra>
// kernel: batch_transform.1
= control target key start
LH: loop header
LB: loop body
LE: loop exit
PB: predicated region body
PF: predicated region fallthrough
CT: control target
= control target key end

     0   :  { %s1477_s1 = inlined_call_operand.vmem [shape: bf16[256,512], index: 1, kind: input, shape index: {}]   ;;  %s1478_s0 = inlined_call_operand.vmem [shape: bf16[8,256], index: 0, kind: input, shape index: {}]   ;;  %s1479_s3 = inlined_call_operand.vmem [shape: bf16[512,128], index: 3, kind: input, shape index: {}]   ;;  %s1480_s2 = inlined_call_operand.vmem [shape: f32[1,512], index: 2, kind: input, shape index: {}]   ;;  %s1481_s4 = inlined_call_operand.vmem [shape: f32[1,128], index: 4, kind: input, shape index: {}]   ;;  %s1482_s5 = inlined_call_operand.vmem [shape: f32[8,128], index: 5, kind: output, shape index: {}]  }
   0x1   :  { %v1017_v0 = vld [vmem:[%s1477_s1 + $0x4] ss:$16 sps:$4 sm:$0xff]   ;;  %v1019_v1 = vld [vmem:[%s1477_s1 + $0xc] ss:$16 sps:$4 sm:$0xff]   ;;  %v1021_v2 = vld [vmem:[%s1477_s1] ss:$16 sps:$4 sm:$0xff]  }
   0x2   :  { %435 = vmatprep.subr.bf16.mxu0 %v1017_v0  ;;  %v1022_v3 = vld [vmem:[%s1477_s1 + $0x8] ss:$16 sps:$4 sm:$0xff]   ;;  %476 = vmatprep.subr.bf16.mxu1 %v1019_v1  ;;  %v1023_v4 = vld [vmem:[%s1477_s1 + $0x24] ss:$16 sps:$4 sm:$0xff]   ;;  %v1025_v5 = vld [vmem:[%s1477_s1 + $0x2c] ss:$16 sps:$4 sm:$0xff]  }
   0x3   :  { %436 = vmatpush1.bf16.msra.mxu0 %v1021_v2  ;;  %477 = vmatpush1.bf16.msra.mxu1 %v1022_v3  ;;  %v1027_v6 = vld [vmem:[%s1477_s1 + $0x20] ss:$16 sps:$4 sm:$0xff]   ;;  %v1028_v7 = vld [vmem:[%s1477_s1 + $0x28] ss:$16 sps:$4 sm:$0xff]   ;;  %v1029_v8 = vld [vmem:[%s1477_s1 + $0x44] ss:$16 sps:$4 sm:$0xff]  }
   0x4   :  { %437 = vmatprep.subr.bf16.mxu0 %v1023_v4  ;;  %478 = vmatprep.subr.bf16.mxu1 %v1025_v5  ;;  %v1031_v9 = vld [vmem:[%s1477_s1 + $0x4c] ss:$16 sps:$4 sm:$0xff]   ;;  %v1033_v10 = vld [vmem:[%s1477_s1 + $0x40] ss:$16 sps:$4 sm:$0xff]   ;;  %v1034_v11 = vld [vmem:[%s1477_s1 + $0x48] ss:$16 sps:$4 sm:$0xff]  }
   0x5   :  { %v1035_v12 = vld [vmem:[%s1477_s1 + $0x64] ss:$16 sps:$4 sm:$0xff]   ;;  %v1037_v13 = vld [vmem:[%s1477_s1 + $0x6c] ss:$16 sps:$4 sm:$0xff]   ;;  %v1039_v14 = vld [vmem:[%s1477_s1 + $0x60] ss:$16 sps:$4 sm:$0xff]  }
   0x6   :  { %v1040_v15 = vld [vmem:[%s1477_s1 + $0x68] ss:$16 sps:$4 sm:$0xff]   ;;  %v1041_v16 = vld [vmem:[%s1477_s1 + $0x84] ss:$16 sps:$4 sm:$0xff]   ;;  %v1043_v17 = vld [vmem:[%s1477_s1 + $0x8c] ss:$16 sps:$4 sm:$0xff]  }
   0x7   :  { %438 = vmatpush1.bf16.msra.mxu0 %v1027_v6  ;;  %479 = vmatpush1.bf16.msra.mxu1 %v1028_v7  ;;  %v1045_v18 = vld [vmem:[%s1477_s1 + $0x80] ss:$16 sps:$4 sm:$0xff]   ;;  %v1046_v19 = vld [vmem:[%s1477_s1 + $0x88] ss:$16 sps:$4 sm:$0xff]   ;;  %v1047_v20 = vld [vmem:[%s1477_s1 + $0xa4] ss:$16 sps:$4 sm:$0xff]  }
   0x8   :  { %439 = vmatprep.subr.bf16.mxu0 %v1029_v8  ;;  %480 = vmatprep.subr.bf16.mxu1 %v1031_v9  ;;  %v1049_v21 = vld [vmem:[%s1477_s1 + $0xac] ss:$16 sps:$4 sm:$0xff]   ;;  %v1051_v22 = vld [vmem:[%s1477_s1 + $0xa0] ss:$16 sps:$4 sm:$0xff]   ;;  %v1052_v23 = vld [vmem:[%s1477_s1 + $0xa8] ss:$16 sps:$4 sm:$0xff]  }
   0x9   :  { %v1053_v24 = vld [vmem:[%s1477_s1 + $0xc4] ss:$16 sps:$4 sm:$0xff]   ;;  %v1055_v25 = vld [vmem:[%s1477_s1 + $0xcc] ss:$16 sps:$4 sm:$0xff]   ;;  %v1057_v26 = vld [vmem:[%s1477_s1 + $0xc0] ss:$16 sps:$4 sm:$0xff]  }
   0xa   :  { %v1058_v27 = vld [vmem:[%s1477_s1 + $0xc8] ss:$16 sps:$4 sm:$0xff]   ;;  %v1059_v28 = vld [vmem:[%s1477_s1 + $0xe4] ss:$16 sps:$4 sm:$0xff]   ;;  %v1061_v29 = vld [vmem:[%s1477_s1 + $0xec] ss:$16 sps:$4 sm:$0xff]  }
   0xb   :  { %440 = vmatpush1.bf16.msra.mxu0 %v1033_v10  ;;  %481 = vmatpush1.bf16.msra.mxu1 %v1034_v11  ;;  %v1063_v30 = vld [vmem:[%s1477_s1 + $0xe0] ss:$16 sps:$4 sm:$0xff]   ;;  %v1064_v31 = vld [vmem:[%s1477_s1 + $0xe8] ss:$16 sps:$4 sm:$0xff]   ;;  %v1065_v32 = vld [vmem:[%s1477_s1 + $0x104] ss:$16 sps:$4 sm:$0xff]  }
   0xc   :  { %441 = vmatprep.subr.bf16.mxu0 %v1035_v12  ;;  %482 = vmatprep.subr.bf16.mxu1 %v1037_v13  ;;  %v1067_v33 = vld [vmem:[%s1477_s1 + $0x10c] ss:$16 sps:$4 sm:$0xff]   ;;  %v1069_v34 = vld [vmem:[%s1477_s1 + $0x100] ss:$16 sps:$4 sm:$0xff]   ;;  %v1070_v35 = vld [vmem:[%s1477_s1 + $0x108] ss:$16 sps:$4 sm:$0xff]  }
   0xd   :  { %v1071_v36 = vld [vmem:[%s1477_s1 + $0x124] ss:$16 sps:$4 sm:$0xff]   ;;  %v1073_v37 = vld [vmem:[%s1477_s1 + $0x12c] ss:$16 sps:$4 sm:$0xff]   ;;  %v1075_v38 = vld [vmem:[%s1477_s1 + $0x120] ss:$16 sps:$4 sm:$0xff]  }
   0xe   :  { %v1076_v39 = vld [vmem:[%s1477_s1 + $0x128] ss:$16 sps:$4 sm:$0xff]   ;;  %v1077_v40 = vld [vmem:[%s1477_s1 + $0x144] ss:$16 sps:$4 sm:$0xff]   ;;  %v1079_v41 = vld [vmem:[%s1477_s1 + $0x14c] ss:$16 sps:$4 sm:$0xff]  }
   0xf   :  { %442 = vmatpush1.bf16.msra.mxu0 %v1039_v14  ;;  %483 = vmatpush1.bf16.msra.mxu1 %v1040_v15  ;;  %v1081_v42 = vld [vmem:[%s1477_s1 + $0x140] ss:$16 sps:$4 sm:$0xff]   ;;  %v1082_v43 = vld [vmem:[%s1477_s1 + $0x148] ss:$16 sps:$4 sm:$0xff]   ;;  %v1083_v44 = vld [vmem:[%s1477_s1 + $0x164] ss:$16 sps:$4 sm:$0xff]  }
  0x10   :  { %443 = vmatprep.subr.bf16.mxu0 %v1041_v16  ;;  %484 = vmatprep.subr.bf16.mxu1 %v1043_v17  ;;  %v1085_v45 = vld [vmem:[%s1477_s1 + $0x16c] ss:$16 sps:$4 sm:$0xff]   ;;  %v1087_v46 = vld [vmem:[%s1477_s1 + $0x160] ss:$16 sps:$4 sm:$0xff]   ;;  %v1088_v48 = vld [vmem:[%s1477_s1 + $0x168] ss:$16 sps:$4 sm:$0xff]  }
  0x11   :  { %v21_v47 = vld [vmem:[%s1478_s0] sm:$0xff]  ;;  %v1091_v51 = vld [vmem:[%s1477_s1 + $0x18c] ss:$16 sps:$4 sm:$0xff]   ;;  %v1094_v53 = vld [vmem:[%s1477_s1 + $0x188] ss:$16 sps:$4 sm:$0xff]  }
  0x12   :  { %v875_v49 = vcombine.high %v21_v47, %v21_v47  ;;  %v1089_v50 = vld [vmem:[%s1477_s1 + $0x184] ss:$16 sps:$4 sm:$0xff]   ;;  %v1093_v52 = vld [vmem:[%s1477_s1 + $0x180] ss:$16 sps:$4 sm:$0xff]   ;;  %v1097_v55 = vld [vmem:[%s1477_s1 + $0x1ac] ss:$16 sps:$4 sm:$0xff]   ;;  %v874_v5 = vcombine.low %v21_v47, %v21_v47 }
  0x13   :  { %444 = vmatpush1.bf16.msra.mxu0 %v1045_v18  ;;  %485 = vmatpush1.bf16.msra.mxu1 %v1046_v19  ;;  %v1095_v54 = vld [vmem:[%s1477_s1 + $0x1a4] ss:$16 sps:$4 sm:$0xff]   ;;  %v1099_v56 = vld [vmem:[%s1477_s1 + $0x1a0] ss:$16 sps:$4 sm:$0xff]   ;;  %v1100_v57 = vld [vmem:[%s1477_s1 + $0x1a8] ss:$16 sps:$4 sm:$0xff]  }
  0x14   :  { %445 = vmatprep.subr.bf16.mxu0 %v1047_v20  ;;  %486 = vmatprep.subr.bf16.mxu1 %v1049_v21  ;;  %v1101_v58 = vld [vmem:[%s1477_s1 + $0x1c4] ss:$16 sps:$4 sm:$0xff]   ;;  %v1103_v59 = vld [vmem:[%s1477_s1 + $0x1cc] ss:$16 sps:$4 sm:$0xff]   ;;  %v1105_v60 = vld [vmem:[%s1477_s1 + $0x1c0] ss:$16 sps:$4 sm:$0xff]  }
  0x15   :  { %467 = vmatprep.mubr.bf16.mxu0 %v875_v49  ;;  %508 = vmatprep.mubr.bf16.mxu1 %v875_v49  ;;  %v1106_v61 = vld [vmem:[%s1477_s1 + $0x1c8] ss:$16 sps:$4 sm:$0xff]   ;;  %v1107_v62 = vld [vmem:[%s1477_s1 + $0x1e4] ss:$16 sps:$4 sm:$0xff]   ;;  %v1109_v63 = vld [vmem:[%s1477_s1 + $0x1ec] ss:$16 sps:$4 sm:$0xff]  }
  0x16   :  { %v1111_v0 = vld [vmem:[%s1477_s1 + $0x1e0] ss:$16 sps:$4 sm:$0xff]   ;;  %v1112_v1 = vld [vmem:[%s1477_s1 + $0x1e8] ss:$16 sps:$4 sm:$0xff]  }
  0x17   :  { %446 = vmatpush1.bf16.msra.mxu0 %v1051_v22  ;;  %487 = vmatpush1.bf16.msra.mxu1 %v1052_v23  ;;  %v1115_v2 = vld [vmem:[%s1479_s3 + $0x40] sm:$0xff]   ;;  %v1119_v7 = vld [vmem:[%s1479_s3 + $0x48] sm:$0xff]   ;;  %v1123_v11 = vld [vmem:[%s1479_s3 + $0x50] sm:$0xff]  }
  0x18   :  { %447 = vmatprep.subr.bf16.mxu0 %v1053_v24  ;;  %488 = vmatprep.subr.bf16.mxu1 %v1055_v25  ;;  %v1116_v3 = vld [vmem:[%s1479_s3 + $0xc0] sm:$0xff]   ;;  %v1120_v8 = vld [vmem:[%s1479_s3 + $0xc8] sm:$0xff]   ;;  %v1124_v12 = vld [vmem:[%s1479_s3 + $0xd0] sm:$0xff]  }
  0x19   :  { %v1117_v4 = vld [vmem:[%s1479_s3] sm:$0xff]   ;;  %v1121_v9 = vld [vmem:[%s1479_s3 + $0x8] sm:$0xff]   ;;  %v1125_v13 = vld [vmem:[%s1479_s3 + $0x10] sm:$0xff]  }
  0x1a   :  { %v1118_v6 = vld [vmem:[%s1479_s3 + $0x80] sm:$0xff]   ;;  %v1122_v10 = vld [vmem:[%s1479_s3 + $0x88] sm:$0xff]   ;;  %v1126_v14 = vld [vmem:[%s1479_s3 + $0x90] sm:$0xff]  }
  0x1b   :  { %448 = vmatpush1.bf16.msra.mxu0 %v1057_v26  ;;  %489 = vmatpush1.bf16.msra.mxu1 %v1058_v27  ;;  %v1127_v15 = vld [vmem:[%s1479_s3 + $0x58] sm:$0xff]   ;;  %v1131_v19 = vld [vmem:[%s1479_s3 + $0x60] sm:$0xff]   ;;  %v1135_v23 = vld [vmem:[%s1479_s3 + $0x68] sm:$0xff]  }
  0x1c   :  { %449 = vmatprep.subr.bf16.mxu0 %v1059_v28  ;;  %490 = vmatprep.subr.bf16.mxu1 %v1061_v29  ;;  %v1128_v16 = vld [vmem:[%s1479_s3 + $0xd8] sm:$0xff]   ;;  %v1132_v20 = vld [vmem:[%s1479_s3 + $0xe0] sm:$0xff]   ;;  %v1136_v24 = vld [vmem:[%s1479_s3 + $0xe8] sm:$0xff]  }
  0x1d   :  { %v1129_v17 = vld [vmem:[%s1479_s3 + $0x18] sm:$0xff]   ;;  %v1133_v21 = vld [vmem:[%s1479_s3 + $0x20] sm:$0xff]   ;;  %v1137_v25 = vld [vmem:[%s1479_s3 + $0x28] sm:$0xff]  }
  0x1e   :  { %v1130_v18 = vld [vmem:[%s1479_s3 + $0x98] sm:$0xff]   ;;  %v1134_v22 = vld [vmem:[%s1479_s3 + $0xa0] sm:$0xff]   ;;  %v1138_v26 = vld [vmem:[%s1479_s3 + $0xa8] sm:$0xff]  }
  0x1f   :  { %450 = vmatpush1.bf16.msra.mxu0 %v1063_v30  ;;  %491 = vmatpush1.bf16.msra.mxu1 %v1064_v31  ;;  %v1139_v27 = vld [vmem:[%s1479_s3 + $0x70] sm:$0xff]   ;;  %v1143_v31 = vld [vmem:[%s1479_s3 + $0x78] sm:$0xff]  }
  0x20   :  { %451 = vmatprep.subr.bf16.mxu0 %v1065_v32  ;;  %492 = vmatprep.subr.bf16.mxu1 %v1067_v33  ;;  %v1140_v28 = vld [vmem:[%s1479_s3 + $0xf0] sm:$0xff]   ;;  %v1144_v32 = vld [vmem:[%s1479_s3 + $0xf8] sm:$0xff]  }
  0x21   :  { %v1141_v29 = vld [vmem:[%s1479_s3 + $0x30] sm:$0xff]   ;;  %v1145_v33 = vld [vmem:[%s1479_s3 + $0x38] sm:$0xff]  }
  0x22   :  { %v1142_v30 = vld [vmem:[%s1479_s3 + $0xb0] sm:$0xff]  }
  0x23   :  { %452 = vmatpush1.bf16.msra.mxu0 %v1069_v34  ;;  %493 = vmatpush1.bf16.msra.mxu1 %v1070_v35  ;;  %v1146_v34 = vld [vmem:[%s1479_s3 + $0xb8] sm:$0xff]   ;;  %v88_v35 = vlaneseq }
  0x24   :  { %453 = vmatprep.subr.bf16.mxu0 %v1071_v36  ;;  %494 = vmatprep.subr.bf16.mxu1 %v1073_v37 }
  0x25   :  { %v89_v36 = vshrl.u32 %v88_v35, 7 }
  0x27   :  { %454 = vmatpush1.bf16.msra.mxu0 %v1075_v38  ;;  %495 = vmatpush1.bf16.msra.mxu1 %v1076_v39  ;;  %v90_v37 = vsub.s32 0, %v89_v36  ;;  %v98_v38 = vsub.s32 2, %v89_v36  ;;  %v86_v39 = vld [vmem:[%s1480_s2] sm:$0xf] }
  0x28   :  { %455 = vmatprep.subr.bf16.mxu0 %v1077_v40  ;;  %496 = vmatprep.subr.bf16.mxu1 %v1079_v41  ;;  %v94_v40 = vsub.s32 1, %v89_v36  ;;  %v102_v41 = vsub.s32 3, %v89_v36 }
  0x2b   :  { %456 = vmatpush1.bf16.msra.mxu0 %v1081_v42  ;;  %497 = vmatpush1.bf16.msra.mxu1 %v1082_v43  ;;  %v91_v42 = vrot.slane %v86_v39, %v90_v37  ;;  %v99_v43 = vrot.slane %v86_v39, %v98_v38 }
  0x2c   :  { %457 = vmatprep.subr.bf16.mxu0 %v1083_v44  ;;  %498 = vmatprep.subr.bf16.mxu1 %v1085_v45  ;;  %v95_v44 = vrot.slane %v86_v39, %v94_v40  ;;  %v103_v45 = vrot.slane %v86_v39, %v102_v41 }
  0x2f   :  { %458 = vmatpush1.bf16.msra.mxu0 %v1087_v46  ;;  %499 = vmatpush1.bf16.msra.mxu1 %v1088_v48 }
  0x30   :  { %459 = vmatprep.subr.bf16.mxu0 %v1089_v50  ;;  %500 = vmatprep.subr.bf16.mxu1 %v1091_v51 }
  0x33   :  { %460 = vmatpush1.bf16.msra.mxu0 %v1093_v52  ;;  %501 = vmatpush1.bf16.msra.mxu1 %v1094_v53 }
  0x34   :  { %461 = vmatprep.subr.bf16.mxu0 %v1095_v54  ;;  %502 = vmatprep.subr.bf16.mxu1 %v1097_v55 }
  0x37   :  { %462 = vmatpush1.bf16.msra.mxu0 %v1099_v56  ;;  %503 = vmatpush1.bf16.msra.mxu1 %v1100_v57 }
  0x38   :  { %463 = vmatprep.subr.bf16.mxu0 %v1101_v58  ;;  %504 = vmatprep.subr.bf16.mxu1 %v1103_v59 }
  0x3b   :  { %464 = vmatpush1.bf16.msra.mxu0 %v1105_v60  ;;  %505 = vmatpush1.bf16.msra.mxu1 %v1106_v61 }
  0x3c   :  { %465 = vmatprep.subr.bf16.mxu0 %v1107_v62  ;;  %506 = vmatprep.subr.bf16.mxu1 %v1109_v63 }
  0x3f   :  { %466 = vmatpush1.bf16.msra.mxu0 %v1111_v0  ;;  %507 = vmatpush1.bf16.msra.mxu1 %v1112_v1 }
  0x40   :  { %973 = vmatprep.subr.bf16.mxu0 %v1115_v2  ;;  %995 = vmatprep.subr.bf16.mxu1 %v1116_v3 }
  0x42   :  { %468 = vmatmul.mubr.bf16.vlgmr.msra.gmra.mrb[0].mxu0 %v874_v5  ;;  %509 = vmatmul.mubr.bf16.vlgmr.msra.gmra.mrb[0].mxu1 %v874_v5 }
  0x43   :  { %974 = vmatpush3.bf16.msra.mxu0 %v1117_v4  ;;  %996 = vmatpush3.bf16.msra.mxu1 %v1118_v6  ;;  %v940_v4 = vld [vmem:[%s1481_s4] ss:$0 sm:$0xff] }
  0x44   :  { %975 = vmatprep.subr.bf16.mxu0 %v1119_v7  ;;  %997 = vmatprep.subr.bf16.mxu1 %v1120_v8 }
  0x47   :  { %976 = vmatpush3.bf16.msra.mxu0 %v1121_v9  ;;  %998 = vmatpush3.bf16.msra.mxu1 %v1122_v10 }
  0x48   :  { %977 = vmatprep.subr.bf16.mxu0 %v1123_v11  ;;  %999 = vmatprep.subr.bf16.mxu1 %v1124_v12 }
  0x4b   :  { %978 = vmatpush3.bf16.msra.mxu0 %v1125_v13  ;;  %1000 = vmatpush3.bf16.msra.mxu1 %v1126_v14 }
  0x4c   :  { %979 = vmatprep.subr.bf16.mxu0 %v1127_v15  ;;  %1001 = vmatprep.subr.bf16.mxu1 %v1128_v16 }
  0x4f   :  { %980 = vmatpush3.bf16.msra.mxu0 %v1129_v17  ;;  %1002 = vmatpush3.bf16.msra.mxu1 %v1130_v18 }
  0x50   :  { %981 = vmatprep.subr.bf16.mxu0 %v1131_v19  ;;  %1003 = vmatprep.subr.bf16.mxu1 %v1132_v20 }
  0x53   :  { %982 = vmatpush3.bf16.msra.mxu0 %v1133_v21  ;;  %1004 = vmatpush3.bf16.msra.mxu1 %v1134_v22 }
  0x54   :  { %983 = vmatprep.subr.bf16.mxu0 %v1135_v23  ;;  %1005 = vmatprep.subr.bf16.mxu1 %v1136_v24 }
  0x57   :  { %984 = vmatpush3.bf16.msra.mxu0 %v1137_v25  ;;  %1006 = vmatpush3.bf16.msra.mxu1 %v1138_v26 }
  0x58   :  { %985 = vmatprep.subr.bf16.mxu0 %v1139_v27  ;;  %1007 = vmatprep.subr.bf16.mxu1 %v1140_v28 }
  0x5b   :  { %986 = vmatpush3.bf16.msra.mxu0 %v1141_v29  ;;  %1008 = vmatpush3.bf16.msra.mxu1 %v1142_v30 }
  0x5c   :  { %987 = vmatprep.subr.bf16.mxu0 %v1143_v31  ;;  %1009 = vmatprep.subr.bf16.mxu1 %v1144_v32 }
  0x5f   :  { %988 = vmatpush3.bf16.msra.mxu0 %v1145_v33  ;;  %1010 = vmatpush3.bf16.msra.mxu1 %v1146_v34 }
 0x115   :  { %v469_v46 = vpop.f32.mrb[0].mxu0  ;;  %v510_v47 = vpop.f32.mrb[0].mxu1 }
 0x116   :  { %v470_v48 = vadd.f32 %v469_v46, %v91_v42  ;;  %v511_v49 = vadd.f32 %v510_v47, %v99_v43  ;;  %v471_v50 = vpop.f32.mrb[1].mxu0  ;;  %v512_v51 = vpop.f32.mrb[1].mxu1 }
 0x117   :  { %v472_v52 = vadd.f32 %v471_v50, %v95_v44  ;;  %v513_v53 = vadd.f32 %v512_v51, %v103_v45  ;;  %v473_v54 = vpop.f32.mrb[2].mxu0  ;;  %v514_v55 = vpop.f32.mrb[2].mxu1 }
 0x118   :  { %v517_v56 = vmax.f32 %v470_v48, 0.0  ;;  %v519_v57 = vmax.f32 %v511_v49, 0.0  ;;  %v474_v58 = vpop.f32.mrb[3].mxu0  ;;  %v515_v59 = vpop.f32.mrb[3].mxu1 }
 0x119   :  { %v518_v60 = vmax.f32 %v472_v52, 0.0  ;;  %v520_v61 = vmax.f32 %v513_v53, 0.0 }
 0x11a   :  { %v523_v62 = vpack.c.bf16 %v519_v57, %v519_v57  ;;  %v521_v1 = vpack.c.bf16 %v517_v56, %v517_v56 }
 0x11b   :  { %v522_v63 = vpack.c.bf16 %v518_v60, %v518_v60  ;;  %v524_v0 = vpack.c.bf16 %v520_v61, %v520_v61 }
 0x11d   :  { %820 = vmatprep.mubr.bf16.mxu0 %v522_v63  ;;  %860 = vmatprep.mubr.bf16.mxu1 %v524_v0 }
 0x11e   :  { %821 = vmatmul.mubr.bf16.vlgmr.msra.gmra.mrb[4].mxu0 %v521_v1  ;;  %861 = vmatmul.mubr.bf16.vlgmr.msra.gmra.mrb[4].mxu1 %v523_v62 }
 0x1f1   :  { %v989_v2 = vpop.f32.mrb[4].mxu0  ;;  %v1011_v3 = vpop.f32.mrb[4].mxu1 }
 0x1f2   :  { %v990_v5 = vpop.f32.mrb[5].mxu0  ;;  %v1012_v6 = vpop.f32.mrb[5].mxu1 }
 0x1f3   :  { %v991_v7 = vadd.f32 %v990_v5, %v989_v2  ;;  %v1013_v8 = vadd.f32 %v1012_v6, %v1011_v3  ;;  %v992_v9 = vpop.f32.mrb[6].mxu0  ;;  %v1014_v10 = vpop.f32.mrb[6].mxu1 }
 0x1f4   :  { %v993_v11 = vpop.f32.mrb[7].mxu0  ;;  %v1015_v12 = vpop.f32.mrb[7].mxu1 }
 0x1f5   :  { %v823_v13 = vadd.f32 %v991_v7, %v940_v4 }
 0x1f7   :  { %v863_v14 = vadd.f32 %v1013_v8, %v823_v13 }
 0x1f9   :  { %v868_v15 = vmax.f32 %v863_v14, 0.0 }
 0x1fb   :  { %869 = vst [vmem:[%s1482_s5] sm:$0xff] %v868_v15 }

</bundles_post_ra>
